<compile_context>
chip_gen: v7x
topology: tpu7x:2x2x1
jax: 0.10.0
libtpu: 0.0.40
codegen_flags: <defaults>
</compile_context>

<pallas_src>
import functools

import jax
import jax.numpy as jnp
from jax.experimental import pallas as pl
from jax.experimental.pallas import tpu as pltpu


# (dy, dx) of taps w[0..8] relative to the 7x7 kernel centre, in the exact
# order the PyTorch module builds weight7x7 (w[t] sits at flat index 5*t+4).
_OFFSETS = ((-3, 1), (-2, -1), (-1, -3), (-1, 2), (0, 0),
            (1, -2), (1, 3), (2, 1), (3, -1))


def _round_up(v, m):
    return ((v + m - 1) // m) * m


def _rotated_conv_kernel(xm_ref, xh_ref, w_ref, b_ref, o_ref, st_ref,
                         *, offs, tile_s, c_in):
    """One (batch, lane-tile) step: stack 9 shifted windows, one MXU matmul."""
    T = tile_s
    # Window = [main tile (T lanes)] ++ [halo block (hp2 lanes)].
    # Tap t's shifted (C_in, T) slice starts at window offset offs[t]
    # (0 < offs[t] < hp2 <= T), i.e. xm[:, off:T] ++ xh[:, 0:off].
    for t, off in enumerate(offs):                    # static, fully unrolled
        r0 = t * c_in
        st_ref[r0:r0 + c_in, 0:T - off] = xm_ref[0, :, off:T]
        st_ref[r0:r0 + c_in, T - off:T] = xh_ref[0, :, 0:off]
    # Single fused matmul: (C_out, 9*C_in) x (9*C_in, T), f32 accumulation.
    acc = jnp.dot(w_ref[...], st_ref[...], preferred_element_type=jnp.float32)
    o_ref[0] = (acc + b_ref[...]).astype(o_ref.dtype)


def rotated_conv2d_3x3(x, weight, bias, *, vmem_budget_bytes=12 << 20):
    """x: (N, C_in, H, W); weight: (9, C_out, C_in); bias: (C_out,)."""
    N, C_in, H, W = x.shape
    assert weight.shape[0] == 9 and weight.shape[2] == C_in
    C_out = weight.shape[1]
    dt = x.dtype
    isz = jnp.dtype(dt).itemsize

    # Column-pad each row by 3 on both sides, flatten rows: a tap (dy, dx)
    # becomes a static lane shift dy*Wp + dx with no column wrap-around; rows
    # outside the image land in the zero halo padding of the flat axis.
    Wp = W + 6
    Sp = H * Wp
    halo = 3 * Wp + 3                     # max |dy*Wp + dx| over the 9 taps
    halo_pad = _round_up(halo + 1, 128)   # strictly > halo -> 0 < off < hp2
    hp2 = 2 * halo_pad                    # lane length of the halo block

    # Lane tile: multiple of hp2 (keeps the halo block lane-block aligned),
    # sized so resident per-step buffers (double-buffered input, stacked MXU
    # operand, double-buffered output) take ~vmem_budget_bytes, clamped to the
    # image.  Big tiles amortize the ~0.35 us/step pipeline overhead.
    per_lane = isz * (2 * C_in + 9 * C_in + 2 * C_out)
    tile_s = max(hp2, (max(hp2, vmem_budget_bytes // per_lane) // hp2) * hp2)
    tile_s = min(tile_s, _round_up(Sp, hp2))
    num_tiles = -(-Sp // tile_s)
    ratio = tile_s // hp2
    L = (num_tiles + 1) * tile_s          # divisible by both tile_s and hp2

    # Window offset of each tap inside [main tile ++ halo block].
    offs = tuple(halo_pad + dy * Wp + dx for dy, dx in _OFFSETS)

    # Padded flat input: halo_pad zeros in front, data, zeros up to L lanes.
    x_cp = jnp.pad(x, ((0, 0), (0, 0), (0, 0), (3, 3)))            # (N,C,H,Wp)
    x_pf = jnp.pad(x_cp.reshape(N, C_in, Sp),
                   ((0, 0), (0, 0), (halo_pad, L - halo_pad - Sp)))

    # Stacked weight: w_st[o, t*C_in + c] = weight[t, o, c]  ->  K = 9*C_in.
    w_st = jnp.transpose(weight, (1, 0, 2)).reshape(C_out, 9 * C_in).astype(dt)
    b_col = bias.reshape(C_out, 1).astype(jnp.float32)

    kernel = functools.partial(_rotated_conv_kernel, offs=offs,
                               tile_s=tile_s, c_in=C_in)

    # Explicit scoped-VMEM limit with headroom, capped to fit v7x (64 MiB).
    vmem_est = isz * (2 * C_in * (tile_s + hp2) + 9 * C_in * tile_s
                      + 2 * C_out * tile_s + 9 * C_in * C_out) + 4 * C_out
    vmem_limit = int(min(48 << 20, max(24 << 20, 2 * vmem_est)))

    out = pl.pallas_call(
        kernel,
        out_shape=jax.ShapeDtypeStruct((N, C_out, num_tiles * tile_s), dt),
        grid_spec=pltpu.PrefetchScalarGridSpec(
            num_scalar_prefetch=0,
            grid=(N, num_tiles),
            in_specs=[
                # main lane tile j, plus a small halo block right after it
                pl.BlockSpec((1, C_in, tile_s), lambda n, j: (n, 0, j)),
                pl.BlockSpec((1, C_in, hp2),
                             lambda n, j: (n, 0, (j + 1) * ratio)),
                pl.BlockSpec((C_out, 9 * C_in), lambda n, j: (0, 0)),   # w
                pl.BlockSpec((C_out, 1), lambda n, j: (0, 0)),          # bias
            ],
            out_specs=pl.BlockSpec((1, C_out, tile_s), lambda n, j: (n, 0, j)),
            scratch_shapes=[pltpu.VMEM((9 * C_in, tile_s), dt)],
        ),
        compiler_params=pltpu.CompilerParams(
            dimension_semantics=("parallel", "parallel"),
            vmem_limit_bytes=vmem_limit,
        ),
        cost_estimate=pl.CostEstimate(
            flops=2 * 9 * C_in * C_out * N * H * W,
            transcendentals=0,
            bytes_accessed=int(x.size * isz + N * C_out * H * W * isz
                               + weight.size
                               * jnp.dtype(weight.dtype).itemsize),
        ),
    )(x_pf, x_pf, w_st, b_col)

    # Drop the flat tail, un-flatten, and trim the 3+3 pad columns per row.
    out = out[:, :, :Sp].reshape(N, C_out, H, Wp)
    return out[:, :, :, 3:3 + W]


def _reference(x, weight, bias):
    """Direct port of the PyTorch forward: build the 7x7 kernel, conv pad=3."""
    C_out, C_in = weight.shape[1], weight.shape[2]
    w77 = jnp.zeros((C_out, C_in, 7, 7), jnp.float32)
    for t, (dy, dx) in enumerate(_OFFSETS):
        w77 = w77.at[:, :, dy + 3, dx + 3].set(weight[t])
    y = jax.lax.conv_general_dilated(
        x.astype(jnp.float32), w77, window_strides=(1, 1),
        padding=((3, 3), (3, 3)),
        dimension_numbers=("NCHW", "OIHW", "NCHW"),
        precision=jax.lax.Precision.HIGHEST)
    return y + bias.reshape(1, -1, 1, 1)


if __name__ == "__main__":
    key = jax.random.PRNGKey(0)
    kx, kw, kb = jax.random.split(key, 3)

    N, C_in, C_out, H, W = 2, 4, 8, 16, 16
    x = jax.random.normal(kx, (N, C_in, H, W), dtype=jnp.float32)
    # kaiming_normal_-style init for the (9, C_out, C_in) weight
    weight = (jax.random.normal(kw, (9, C_out, C_in), jnp.float32)
              * (2.0 / C_in) ** 0.5)
    # module inits bias to zeros; small random bias exercises the bias add
    bias = jax.random.normal(kb, (C_out,), jnp.float32) * 0.1

    y = rotated_conv2d_3x3(x, weight, bias)
    y = jax.block_until_ready(y)

    y_ref = _reference(x, weight, bias)
    assert y.shape == (N, C_out, H, W) and y.dtype == x.dtype
    max_err = float(jnp.max(jnp.abs(y - y_ref)))
    assert jnp.allclose(y, y_ref, atol=5e-4, rtol=5e-4), f"mismatch: {max_err}"
    print("KERNEL_OK")
</pallas_src>

<mosaic_0001>
module attributes {stable_mosaic.version = 11 : i64} {
  func.func @_rotated_conv_kernel(%arg0: i32, %arg1: i32, %arg2: memref<1x4x512xf32, #tpu.memory_space<vmem>>, %arg3: memref<1x4x256xf32, #tpu.memory_space<vmem>>, %arg4: memref<8x36xf32, #tpu.memory_space<vmem>>, %arg5: memref<8x1xf32, #tpu.memory_space<vmem>>, %arg6: memref<1x8x512xf32, #tpu.memory_space<vmem>>, %arg7: memref<36x512xf32, #tpu.memory_space<vmem>>) attributes {dimension_semantics = [#tpu.dimension_semantics<parallel>, #tpu.dimension_semantics<parallel>], iteration_bounds = array<i64: 2, 1>, scalar_prefetch = 0 : i64, scratch_operands = 1 : i64, tpu.core_type = #tpu.core_type<tc>, window_params = [{transform_indices = @transform_0, window_bounds = array<i64: 1, 4, 512>}, {transform_indices = @transform_1, window_bounds = array<i64: 1, 4, 256>}, {pipeline_mode = #tpu.pipeline_mode<synchronous>, transform_indices = @transform_2, window_bounds = array<i64: 8, 36>}, {pipeline_mode = #tpu.pipeline_mode<synchronous>, transform_indices = @transform_3, window_bounds = array<i64: 8, 1>}, {transform_indices = @transform_4, window_bounds = array<i64: 1, 8, 512>}]} {
    %c0 = arith.constant 0 : index
    %c0_0 = arith.constant 0 : index
    %c63 = arith.constant 63 : index
    %0 = vector.load %arg2[%c0, %c0_0, %c63] : memref<1x4x512xf32, #tpu.memory_space<vmem>>, vector<1x4x449xf32>
    %1 = vector.shape_cast %0 : vector<1x4x449xf32> to vector<4x449xf32>
    %c0_1 = arith.constant 0 : index
    %c0_2 = arith.constant 0 : index
    %2 = vector.load %arg7[%c0_1, %c0_2] : memref<36x512xf32, #tpu.memory_space<vmem>>, vector<4x449xf32>
    tpu.vector_store %arg7[%c0_1, %c0_2], %1 {strides = array<i32>} : memref<36x512xf32, #tpu.memory_space<vmem>>, vector<4x449xf32>,
    %c0_3 = arith.constant 0 : index
    %c0_4 = arith.constant 0 : index
    %c0_5 = arith.constant 0 : index
    %3 = vector.load %arg3[%c0_3, %c0_4, %c0_5] : memref<1x4x256xf32, #tpu.memory_space<vmem>>, vector<1x4x63xf32>
    %4 = vector.shape_cast %3 : vector<1x4x63xf32> to vector<4x63xf32>
    %c0_6 = arith.constant 0 : index
    %c449 = arith.constant 449 : index
    %5 = vector.load %arg7[%c0_6, %c449] : memref<36x512xf32, #tpu.memory_space<vmem>>, vector<4x63xf32>
    tpu.vector_store %arg7[%c0_6, %c449], %4 {strides = array<i32>} : memref<36x512xf32, #tpu.memory_space<vmem>>, vector<4x63xf32>,
    %c0_7 = arith.constant 0 : index
    %c0_8 = arith.constant 0 : index
    %c83 = arith.constant 83 : index
    %6 = vector.load %arg2[%c0_7, %c0_8, %c83] : memref<1x4x512xf32, #tpu.memory_space<vmem>>, vector<1x4x429xf32>
    %7 = vector.shape_cast %6 : vector<1x4x429xf32> to vector<4x429xf32>
    %c4 = arith.constant 4 : index
    %c0_9 = arith.constant 0 : index
    %8 = vector.load %arg7[%c4, %c0_9] : memref<36x512xf32, #tpu.memory_space<vmem>>, vector<4x429xf32>
    tpu.vector_store %arg7[%c4, %c0_9], %7 {strides = array<i32>} : memref<36x512xf32, #tpu.memory_space<vmem>>, vector<4x429xf32>,
    %c0_10 = arith.constant 0 : index
    %c0_11 = arith.constant 0 : index
    %c0_12 = arith.constant 0 : index
    %9 = vector.load %arg3[%c0_10, %c0_11, %c0_12] : memref<1x4x256xf32, #tpu.memory_space<vmem>>, vector<1x4x83xf32>
    %10 = vector.shape_cast %9 : vector<1x4x83xf32> to vector<4x83xf32>
    %c4_13 = arith.constant 4 : index
    %c429 = arith.constant 429 : index
    %11 = vector.load %arg7[%c4_13, %c429] : memref<36x512xf32, #tpu.memory_space<vmem>>, vector<4x83xf32>
    tpu.vector_store %arg7[%c4_13, %c429], %10 {strides = array<i32>} : memref<36x512xf32, #tpu.memory_space<vmem>>, vector<4x83xf32>,
    %c0_14 = arith.constant 0 : index
    %c0_15 = arith.constant 0 : index
    %c103 = arith.constant 103 : index
    %12 = vector.load %arg2[%c0_14, %c0_15, %c103] : memref<1x4x512xf32, #tpu.memory_space<vmem>>, vector<1x4x409xf32>
    %13 = vector.shape_cast %12 : vector<1x4x409xf32> to vector<4x409xf32>
    %c8 = arith.constant 8 : index
    %c0_16 = arith.constant 0 : index
    %14 = vector.load %arg7[%c8, %c0_16] : memref<36x512xf32, #tpu.memory_space<vmem>>, vector<4x409xf32>
    tpu.vector_store %arg7[%c8, %c0_16], %13 {strides = array<i32>} : memref<36x512xf32, #tpu.memory_space<vmem>>, vector<4x409xf32>,
    %c0_17 = arith.constant 0 : index
    %c0_18 = arith.constant 0 : index
    %c0_19 = arith.constant 0 : index
    %15 = vector.load %arg3[%c0_17, %c0_18, %c0_19] : memref<1x4x256xf32, #tpu.memory_space<vmem>>, vector<1x4x103xf32>
    %16 = vector.shape_cast %15 : vector<1x4x103xf32> to vector<4x103xf32>
    %c8_20 = arith.constant 8 : index
    %c409 = arith.constant 409 : index
    %17 = vector.load %arg7[%c8_20, %c409] : memref<36x512xf32, #tpu.memory_space<vmem>>, vector<4x103xf32>
    tpu.vector_store %arg7[%c8_20, %c409], %16 {strides = array<i32>} : memref<36x512xf32, #tpu.memory_space<vmem>>, vector<4x103xf32>,
    %c0_21 = arith.constant 0 : index
    %c0_22 = arith.constant 0 : index
    %c108 = arith.constant 108 : index
    %18 = vector.load %arg2[%c0_21, %c0_22, %c108] : memref<1x4x512xf32, #tpu.memory_space<vmem>>, vector<1x4x404xf32>
    %19 = vector.shape_cast %18 : vector<1x4x404xf32> to vector<4x404xf32>
    %c12 = arith.constant 12 : index
    %c0_23 = arith.constant 0 : index
    %20 = vector.load %arg7[%c12, %c0_23] : memref<36x512xf32, #tpu.memory_space<vmem>>, vector<4x404xf32>
    tpu.vector_store %arg7[%c12, %c0_23], %19 {strides = array<i32>} : memref<36x512xf32, #tpu.memory_space<vmem>>, vector<4x404xf32>,
    %c0_24 = arith.constant 0 : index
    %c0_25 = arith.constant 0 : index
    %c0_26 = arith.constant 0 : index
    %21 = vector.load %arg3[%c0_24, %c0_25, %c0_26] : memref<1x4x256xf32, #tpu.memory_space<vmem>>, vector<1x4x108xf32>
    %22 = vector.shape_cast %21 : vector<1x4x108xf32> to vector<4x108xf32>
    %c12_27 = arith.constant 12 : index
    %c404 = arith.constant 404 : index
    %23 = vector.load %arg7[%c12_27, %c404] : memref<36x512xf32, #tpu.memory_space<vmem>>, vector<4x108xf32>
    tpu.vector_store %arg7[%c12_27, %c404], %22 {strides = array<i32>} : memref<36x512xf32, #tpu.memory_space<vmem>>, vector<4x108xf32>,
    %c0_28 = arith.constant 0 : index
    %c0_29 = arith.constant 0 : index
    %c128 = arith.constant 128 : index
    %24 = vector.load %arg2[%c0_28, %c0_29, %c128] : memref<1x4x512xf32, #tpu.memory_space<vmem>>, vector<1x4x384xf32>
    %25 = vector.shape_cast %24 : vector<1x4x384xf32> to vector<4x384xf32>
    %c16 = arith.constant 16 : index
    %c0_30 = arith.constant 0 : index
    %26 = vector.load %arg7[%c16, %c0_30] : memref<36x512xf32, #tpu.memory_space<vmem>>, vector<4x384xf32>
    tpu.vector_store %arg7[%c16, %c0_30], %25 {strides = array<i32>} : memref<36x512xf32, #tpu.memory_space<vmem>>, vector<4x384xf32>,
    %c0_31 = arith.constant 0 : index
    %c0_32 = arith.constant 0 : index
    %c0_33 = arith.constant 0 : index
    %27 = vector.load %arg3[%c0_31, %c0_32, %c0_33] : memref<1x4x256xf32, #tpu.memory_space<vmem>>, vector<1x4x128xf32>
    %28 = vector.shape_cast %27 : vector<1x4x128xf32> to vector<4x128xf32>
    %c16_34 = arith.constant 16 : index
    %c384 = arith.constant 384 : index
    %29 = vector.load %arg7[%c16_34, %c384] : memref<36x512xf32, #tpu.memory_space<vmem>>, vector<4x128xf32>
    tpu.vector_store %arg7[%c16_34, %c384], %28 {strides = array<i32>} : memref<36x512xf32, #tpu.memory_space<vmem>>, vector<4x128xf32>,
    %c0_35 = arith.constant 0 : index
    %c0_36 = arith.constant 0 : index
    %c148 = arith.constant 148 : index
    %30 = vector.load %arg2[%c0_35, %c0_36, %c148] : memref<1x4x512xf32, #tpu.memory_space<vmem>>, vector<1x4x364xf32>
    %31 = vector.shape_cast %30 : vector<1x4x364xf32> to vector<4x364xf32>
    %c20 = arith.constant 20 : index
    %c0_37 = arith.constant 0 : index
    %32 = vector.load %arg7[%c20, %c0_37] : memref<36x512xf32, #tpu.memory_space<vmem>>, vector<4x364xf32>
    tpu.vector_store %arg7[%c20, %c0_37], %31 {strides = array<i32>} : memref<36x512xf32, #tpu.memory_space<vmem>>, vector<4x364xf32>,
    %c0_38 = arith.constant 0 : index
    %c0_39 = arith.constant 0 : index
    %c0_40 = arith.constant 0 : index
    %33 = vector.load %arg3[%c0_38, %c0_39, %c0_40] : memref<1x4x256xf32, #tpu.memory_space<vmem>>, vector<1x4x148xf32>
    %34 = vector.shape_cast %33 : vector<1x4x148xf32> to vector<4x148xf32>
    %c20_41 = arith.constant 20 : index
    %c364 = arith.constant 364 : index
    %35 = vector.load %arg7[%c20_41, %c364] : memref<36x512xf32, #tpu.memory_space<vmem>>, vector<4x148xf32>
    tpu.vector_store %arg7[%c20_41, %c364], %34 {strides = array<i32>} : memref<36x512xf32, #tpu.memory_space<vmem>>, vector<4x148xf32>,
    %c0_42 = arith.constant 0 : index
    %c0_43 = arith.constant 0 : index
    %c153 = arith.constant 153 : index
    %36 = vector.load %arg2[%c0_42, %c0_43, %c153] : memref<1x4x512xf32, #tpu.memory_space<vmem>>, vector<1x4x359xf32>
    %37 = vector.shape_cast %36 : vector<1x4x359xf32> to vector<4x359xf32>
    %c24 = arith.constant 24 : index
    %c0_44 = arith.constant 0 : index
    %38 = vector.load %arg7[%c24, %c0_44] : memref<36x512xf32, #tpu.memory_space<vmem>>, vector<4x359xf32>
    tpu.vector_store %arg7[%c24, %c0_44], %37 {strides = array<i32>} : memref<36x512xf32, #tpu.memory_space<vmem>>, vector<4x359xf32>,
    %c0_45 = arith.constant 0 : index
    %c0_46 = arith.constant 0 : index
    %c0_47 = arith.constant 0 : index
    %39 = vector.load %arg3[%c0_45, %c0_46, %c0_47] : memref<1x4x256xf32, #tpu.memory_space<vmem>>, vector<1x4x153xf32>
    %40 = vector.shape_cast %39 : vector<1x4x153xf32> to vector<4x153xf32>
    %c24_48 = arith.constant 24 : index
    %c359 = arith.constant 359 : index
    %41 = vector.load %arg7[%c24_48, %c359] : memref<36x512xf32, #tpu.memory_space<vmem>>, vector<4x153xf32>
    tpu.vector_store %arg7[%c24_48, %c359], %40 {strides = array<i32>} : memref<36x512xf32, #tpu.memory_space<vmem>>, vector<4x153xf32>,
    %c0_49 = arith.constant 0 : index
    %c0_50 = arith.constant 0 : index
    %c173 = arith.constant 173 : index
    %42 = vector.load %arg2[%c0_49, %c0_50, %c173] : memref<1x4x512xf32, #tpu.memory_space<vmem>>, vector<1x4x339xf32>
    %43 = vector.shape_cast %42 : vector<1x4x339xf32> to vector<4x339xf32>
    %c28 = arith.constant 28 : index
    %c0_51 = arith.constant 0 : index
    %44 = vector.load %arg7[%c28, %c0_51] : memref<36x512xf32, #tpu.memory_space<vmem>>, vector<4x339xf32>
    tpu.vector_store %arg7[%c28, %c0_51], %43 {strides = array<i32>} : memref<36x512xf32, #tpu.memory_space<vmem>>, vector<4x339xf32>,
    %c0_52 = arith.constant 0 : index
    %c0_53 = arith.constant 0 : index
    %c0_54 = arith.constant 0 : index
    %45 = vector.load %arg3[%c0_52, %c0_53, %c0_54] : memref<1x4x256xf32, #tpu.memory_space<vmem>>, vector<1x4x173xf32>
    %46 = vector.shape_cast %45 : vector<1x4x173xf32> to vector<4x173xf32>
    %c28_55 = arith.constant 28 : index
    %c339 = arith.constant 339 : index
    %47 = vector.load %arg7[%c28_55, %c339] : memref<36x512xf32, #tpu.memory_space<vmem>>, vector<4x173xf32>
    tpu.vector_store %arg7[%c28_55, %c339], %46 {strides = array<i32>} : memref<36x512xf32, #tpu.memory_space<vmem>>, vector<4x173xf32>,
    %c0_56 = arith.constant 0 : index
    %c0_57 = arith.constant 0 : index
    %c193 = arith.constant 193 : index
    %48 = vector.load %arg2[%c0_56, %c0_57, %c193] : memref<1x4x512xf32, #tpu.memory_space<vmem>>, vector<1x4x319xf32>
    %49 = vector.shape_cast %48 : vector<1x4x319xf32> to vector<4x319xf32>
    %c32 = arith.constant 32 : index
    %c0_58 = arith.constant 0 : index
    %50 = vector.load %arg7[%c32, %c0_58] : memref<36x512xf32, #tpu.memory_space<vmem>>, vector<4x319xf32>
    tpu.vector_store %arg7[%c32, %c0_58], %49 {strides = array<i32>} : memref<36x512xf32, #tpu.memory_space<vmem>>, vector<4x319xf32>,
    %c0_59 = arith.constant 0 : index
    %c0_60 = arith.constant 0 : index
    %c0_61 = arith.constant 0 : index
    %51 = vector.load %arg3[%c0_59, %c0_60, %c0_61] : memref<1x4x256xf32, #tpu.memory_space<vmem>>, vector<1x4x193xf32>
    %52 = vector.shape_cast %51 : vector<1x4x193xf32> to vector<4x193xf32>
    %c32_62 = arith.constant 32 : index
    %c319 = arith.constant 319 : index
    %53 = vector.load %arg7[%c32_62, %c319] : memref<36x512xf32, #tpu.memory_space<vmem>>, vector<4x193xf32>
    tpu.vector_store %arg7[%c32_62, %c319], %52 {strides = array<i32>} : memref<36x512xf32, #tpu.memory_space<vmem>>, vector<4x193xf32>,
    %c0_63 = arith.constant 0 : index
    %c0_64 = arith.constant 0 : index
    %54 = vector.load %arg4[%c0_63, %c0_64] : memref<8x36xf32, #tpu.memory_space<vmem>>, vector<8x36xf32>
    %c0_65 = arith.constant 0 : index
    %c0_66 = arith.constant 0 : index
    %55 = vector.load %arg7[%c0_65, %c0_66] : memref<36x512xf32, #tpu.memory_space<vmem>>, vector<36x512xf32>
    %cst = arith.constant dense<0.000000e+00> : vector<8x512xf32>
    %56 = tpu.matmul %54, %55, %cst {dimension_numbers = #tpu.dot_dimension_numbers<[1], [0], [0], [1], [0, 0, 1, 1], [], []>} : vector<8x36xf32>, vector<36x512xf32>, vector<8x512xf32> -> vector<8x512xf32>
    %c0_67 = arith.constant 0 : index
    %c0_68 = arith.constant 0 : index
    %57 = vector.load %arg5[%c0_67, %c0_68] : memref<8x1xf32, #tpu.memory_space<vmem>>, vector<8x1xf32>
    %58 = vector.broadcast %57 : vector<8x1xf32> to vector<8x512xf32>
    %59 = arith.addf %56, %58 : vector<8x512xf32>
    %c0_69 = arith.constant 0 : index
    %c0_70 = arith.constant 0 : index
    %c0_71 = arith.constant 0 : index
    %60 = vector.load %arg6[%c0_69, %c0_70, %c0_71] : memref<1x8x512xf32, #tpu.memory_space<vmem>>, vector<1x8x512xf32>
    %61 = vector.shape_cast %60 : vector<1x8x512xf32> to vector<8x512xf32>
    %62 = vector.shape_cast %59 : vector<8x512xf32> to vector<1x8x512xf32>
    tpu.vector_store %arg6[%c0_69, %c0_70, %c0_71], %62 {strides = array<i32>} : memref<1x8x512xf32, #tpu.memory_space<vmem>>, vector<1x8x512xf32>,
    return
  }
  func.func @transform_0(%arg0: i32, %arg1: i32) -> (i32, i32, i32) {
    %c0_i32 = arith.constant 0 : i32
    %c0_i32_0 = arith.constant 0 : i32
    return %arg0, %c0_i32, %arg1 : i32, i32, i32
  }
  func.func @transform_1(%arg0: i32, %arg1: i32) -> (i32, i32, i32) {
    %c1_i32 = arith.constant 1 : i32
    %0 = arith.addi %arg1, %c1_i32 : i32
    %c2_i32 = arith.constant 2 : i32
    %1 = arith.muli %0, %c2_i32 : i32
    %c0_i32 = arith.constant 0 : i32
    %c0_i32_0 = arith.constant 0 : i32
    return %arg0, %c0_i32, %1 : i32, i32, i32
  }
  func.func @transform_2(%arg0: i32, %arg1: i32) -> (i32, i32) {
    %c0_i32 = arith.constant 0 : i32
    %c0_i32_0 = arith.constant 0 : i32
    %c0_i32_1 = arith.constant 0 : i32
    return %c0_i32, %c0_i32_0 : i32, i32
  }
  func.func @transform_3(%arg0: i32, %arg1: i32) -> (i32, i32) {
    %c0_i32 = arith.constant 0 : i32
    %c0_i32_0 = arith.constant 0 : i32
    %c0_i32_1 = arith.constant 0 : i32
    return %c0_i32, %c0_i32_0 : i32, i32
  }
  func.func @transform_4(%arg0: i32, %arg1: i32) -> (i32, i32, i32) {
    %c0_i32 = arith.constant 0 : i32
    %c0_i32_0 = arith.constant 0 : i32
    return %arg0, %c0_i32, %arg1 : i32, i32, i32
  }
}

</mosaic_0001>

<bundles_post_ra>
// kernel: tpu_custom_call.1
= control target key start
LH: loop header
LB: loop body
LE: loop exit
PB: predicated region body
PF: predicated region fallthrough
CT: control target
= control target key end

     0   :  { %9 = vsyncpa [#allocation4], 0  ;;  %s1487_s0 = inlined_call_operand.hbm [shape: f32[2,4,1024], index: 0, kind: input, shape index: {}]   ;;  %s1488_s1 = inlined_call_operand.hbm [shape: f32[2,4,1024], index: 1, kind: input, shape index: {}]   ;;  %s1489_s2 = inlined_call_operand.vmem [shape: f32[8,36], index: 2, kind: input, shape index: {}]   ;;  %s1490_s3 = inlined_call_operand.vmem [shape: f32[8,1], index: 3, kind: input, shape index: {}]   ;;  %s1491_s4 = inlined_call_operand.hbm [shape: f32[2,8,512], index: 4, kind: output, shape index: {}]  }
   0x1   :  { %11 = vsyncpa [#allocation4 + $0x1], 0 }
   0x2   :  { %12 = vsyncpa [#allocation7], 0 }
   0x3   :  { %14 = vsyncpa [#allocation7 + $0x1], 0 }
   0x4   :  { %15 = vsyncpa [#allocation5], 0 }
   0x5   :  { %17 = vsyncpa [#allocation5 + $0x1], 0  ;;  %s1210_s15 = smov 0   ;;  %s1212_s16 = smov 0  }
   0x6   :  { %s1214_s17 = smov 0   ;;  %s1216_s18 = smov 0  }
   0x7   :  { %s1218_s19 = smov 0   ;;  %s1220_s20 = smov 0  }
   0x8 LB: > { %s889_s21 = sadd.s32 4294967295, %s1170_s20   ;;  %s890_s22 = sadd.s32 4294967294, %s1170_s20   ;;  %s1170_s20 = sphi %s1220_s20, %s23_s20   ;;  %s1166_s19 = sphi %s1218_s19, %s1511_s19   ;;  %s1162_s18 = sphi %s1216_s18, %s1510_s18   ;;  %s1158_s17 = sphi %s1214_s17, %s1509_s17   ;;  %s1154_s16 = sphi %s1212_s16, %s1508_s16   ;;  %s1150_s15 = sphi %s1210_s15, %s1507_s15  }
   0x9   : > { %s35_s23 = sadd.s32 1, %s1166_s19  ;;  %s44_s24 = sadd.s32 1, %s1158_s17 }
   0xa   : > { %p37_p0 = scmp.ge.s32.totalorder %s35_s23, 2  ;;  %p51_p1 = scmp.ne.s32.totalorder %s1158_s17, %s1154_s16 }
   0xb   : > { %p52_p2 = scmp.eq.s32.totalorder %s1170_s20, 0  ;;  %p57_p3 = scmp.ne.s32.totalorder %s1154_s16, %s1150_s15 }
   0xc   : > { %s1513_s23 = smov (%p37_p0, %s35_s23), 0  ;;  %p58_p5 = scmp.eq.s32.totalorder %s889_s21, 0 }
   0xd   : > { %p1251_p4 = por %p52_p2, %p51_p1  ;;  %s39_s26 = ssub.s32 %s1166_s19, %s1513_s23 }
   0xe   : > { %p157_p6 = scmp.eq.s32.totalorder %s889_s21, 1  ;;  %p42_p7 = scmp.eq.s32.totalorder %s39_s26, 0 }
   0xf   : > { %p1257_p8 = por %p58_p5, %p57_p3  ;;  %p163_p10 = scmp.eq.s32.totalorder %s890_s22, 1 }
  0x10   : > { %p1261_p9 = por %p157_p6, %p51_p1  ;;  %p950_p13 = scmp.lt.s32.totalorder %s1170_s20, 2 }
  0x11   : > { %s1495_s27 = scalar_select %p1257_p8, 1, 0 }
  0x12   : > { %s1496_s28 = scalar_select %p1261_p9, 1, 0 }
  0x13   : > { %s1266_s29 = scalar_select %p42_p7, %s1158_s17, %s44_s24  }
  0x14   : > { %p1268_p11 = por %p163_p10, %p57_p3  ;;  %s1275_s5 = sand.u32 1, %s1158_s17  }
  0x15   : > { %s893_s6 = sshll.u32 %s1275_s5, 4  ;;  %s914_s7 = sshll.u32 %s1166_s19, 9 }
  0x16   : > { %s1497_s30 = scalar_select %p1268_p11, 1, 0 }
  0x17   : > { %s1284_s10 = scalar_lea.hbm %s1487_s0, %s914_s7  ;;  %s193_s11 = scalar_lea.vmem [#allocation3], %s893_s6 }
  0x18   : > { %s203_s12 = sshll.u32 %s193_s11, 4  ;;  %p1290_p0 = pnand %p950_p13, %p1251_p4  ;;  %s1286_s12 = int_to_ptr.vmem [resolvable:$true] %s203_s12 }
  0x19   : > { %s190_s14 = scalar_lea.sflag [#allocation4], %s1275_s5  ;;  %s1023_s21 = scalar_lea.hbm %s1284_s10, 256 }
  0x1a   : > { %p1024_p3 = scmp.ne.s32.totalorder %s1284_s10, %s1023_s21  ;;  %p1025_p5 = pneg %p1290_p0 }
  0x1b   : > { %s1028_s25 = scalar_lea.hbm %s1487_s0, 1024  ;;  %p1029_p4 = scmp.lt.u32.totalorder %s1284_s10, %s1487_s0 }
  0x1c   : > { %p1026_p6 = pnand %p1025_p5, %p1024_p3  ;;  %p1030_p10 = scmp.lt.u32.totalorder %s1028_s25, %s1023_s21 }
  0x1d   : > { %p1032_p12 = scmp.lt.u32.totalorder %s1023_s21, %s1284_s10 }
  0x1e   : > { %p1027_p7 = pneg %p1026_p6  ;;  %p1031_p13 = por %p1030_p10, %p1029_p4 }
  0x20   : > { %p1033_p1 = por %p1032_p12, %p1031_p13 }
  0x22   : > { %p1034_p2 = pnand %p1033_p1, %p1027_p7 }
  0x24   : > { %1037 = shalt.err (!%p1034_p2)
}
  0x25   : > { %s1038_s8 = scalar_lea.vmem %s1286_s12, 256  ;;  %s1172_s9 = smov [#allocation3]  }
  0x26   : > { %p1039_p3 = scmp.ne.s32.totalorder %s1286_s12, %s1038_s8  ;;  %s1043_s11 = sshll.u32 %s1172_s9, 4  ;;  %s1044_s11 = int_to_ptr.vmem [resolvable:$false] %s1043_s11 }
  0x27   : > { %s1045_s22 = scalar_lea.vmem %s1044_s11, 512  ;;  %p1046_p9 = scmp.lt.s32.totalorder %s1286_s12, %s1044_s11 }
  0x28   : > { %p1041_p6 = pnand %p1039_p3, %p1025_p5  ;;  %p1047_p4 = scmp.lt.s32.totalorder %s1045_s22, %s1038_s8 }
  0x2a   : > { %p1042_p11 = pneg %p1041_p6  ;;  %p1048_p10 = por %p1047_p4, %p1046_p9 }
  0x2c   : > { %p1049_p12 = pnand %p1048_p10, %p1042_p11 }
  0x2e   : > { %1052 = shalt.err (!%p1049_p12)
}
  0x2f   : > { %942 = dma.hbm_to_vmem [thread:$0]  (!%p1290_p0), %s1284_s10, 256, %s1286_s12, %s190_s14  }
  0x30   : > { %p1499_p1 = scmp.lt.s32.totalorder %s1170_s20, 3  ;;  %p1500_p2 = scmp.ge.s32.totalorder %s1170_s20, 1 }
  0x31   : > { %s896_s24 = sshll.u32 %s1275_s5, 3  ;;  %s820_s6 = scalar_lea.hbm %s1488_s1, %s914_s7 }
  0x32   : > { %p1326_p7 = pnand %p1500_p2, %p1499_p1  ;;  %s1336_s8 = scalar_lea.hbm %s820_s6, 256 }
  0x33   : > { %s214_s9 = scalar_lea.vmem [#allocation6], %s896_s24  ;;  %s211_s10 = scalar_lea.sflag [#allocation7], %s1275_s5 }
  0x34   : > { %s1501_s21 = scalar_select %p1326_p7, 1, 0 }
  0x35   : > { %s226_s11 = sshll.u32 %s214_s9, 4  ;;  %s1083_s12 = scalar_lea.hbm %s820_s6, 384  ;;  %s227_s11 = int_to_ptr.vmem [resolvable:$true] %s226_s11 }
  0x36   : > { %p1054_p9 = scmp.ne.s32.totalorder %s1336_s8, %s1083_s12  ;;  %s1058_s25 = scalar_lea.hbm %s1488_s1, 1024 }
  0x37   : > { %p1059_p3 = scmp.lt.u32.totalorder %s1336_s8, %s1488_s1  ;;  %p1060_p6 = scmp.lt.u32.totalorder %s1058_s25, %s1083_s12 }
  0x38   : > { %p1056_p11 = pnand %p1054_p9, %p1025_p5  ;;  %p1062_p10 = scmp.lt.u32.totalorder %s1083_s12, %s1336_s8 }
  0x39   : > { %p1061_p4 = por %p1060_p6, %p1059_p3 }
  0x3a   : > { %p1057_p13 = pneg %p1056_p11 }
  0x3b   : > { %p1063_p12 = por %p1062_p10, %p1061_p4 }
  0x3d   : > { %p1064_p1 = pnand %p1063_p12, %p1057_p13 }
  0x3f   : > { %1067 = shalt.err (!%p1064_p1)
}
  0x40   : > { %s1068_s5 = scalar_lea.vmem %s227_s11, 128  ;;  %s1173_s24 = smov [#allocation6]  }
  0x41   : > { %p1069_p2 = scmp.ne.s32.totalorder %s227_s11, %s1068_s5  ;;  %s1073_s6 = sshll.u32 %s1173_s24, 4  ;;  %s1074_s6 = int_to_ptr.vmem [resolvable:$false] %s1073_s6 }
  0x42   : > { %s1075_s9 = scalar_lea.vmem %s1074_s6, 256  ;;  %p1076_p8 = scmp.lt.s32.totalorder %s227_s11, %s1074_s6 }
  0x43   : > { %p1071_p9 = pnand %p1069_p2, %p1025_p5  ;;  %p1077_p7 = scmp.lt.s32.totalorder %s1075_s9, %s1068_s5 }
  0x45   : > { %p1072_p11 = pneg %p1071_p9  ;;  %p1078_p3 = por %p1077_p7, %p1076_p8 }
  0x47   : > { %p1079_p6 = pnand %p1078_p3, %p1072_p11 }
  0x49   : > { %1082 = shalt.err (!%p1079_p6)
}
  0x4a   : > { %945 = dma.hbm_to_vmem [thread:$0]  (!%p1290_p0), %s1336_s8, 128, %s227_s11, %s211_s10  }
  0x4b   : > { %p1502_p13 = scmp.ne.s32.totalorder %s1501_s21, 0 }
  0x4c   : > { %s1360_s12 = sand.u32 (!%p1502_p13), 1, %s1154_s16   ;;  %p1503_p8 = scmp.ne.s32.totalorder (!%p1502_p13), %s1495_s27, 0 }
  0x4d   : > { %235 = sbr.rel (%p1502_p13) target bundleno = 520 (0x208), region = 36  ;;  %s900_s14 = sshll.u32 (!%p1502_p13), %s1360_s12, 4 }
  0x4e   : > { %s238_s22 = scalar_lea.sflag (!%p1502_p13), [#allocation4], %s1360_s12  ;;  %s1364_s25 = scalar_lea.vmem (!%p1502_p13), [#allocation3], %s900_s14 }
  0x54   : > { %1137 = dma.done.wait (%p1503_p8), %s238_s22, 256  }
  0x55   : > { %1139 = vsyncadd (%p1503_p8), %s238_s22, 4294967040  ;;  %s901_s13 = sshll.u32 %s1360_s12, 3  ;;  %s247_s21 = scalar_lea.sflag [#allocation7], %s1360_s12 }
  0x56   : > { %s1372_s8 = scalar_lea.vmem [#allocation6], %s901_s13 }
  0x57   : > { %1141 = dma.done.wait (%p1503_p8), %s247_s21, 128  }
  0x58   : > { %1143 = vsyncadd (%p1503_p8), %s247_s21, 4294967168  ;;  %v319_v0 = vld [vmem:[%s1364_s25] sm:$0xff]  ;;  %v286_v1 = vld [vmem:[%s1364_s25 + $0x8] sm:$0xff]  ;;  %s1174_s11 = smov 45   ;;  %s1175_s10 = smov 65   ;;  %v1182_v22 = vmov 0.0  }
  0x59   : > { %327 = vrot.lane.b32.xlu1 %v319_v0, %s1174_s11  ;;  %295 = vrot.lane.b32.xlu0 %v286_v1, %s1175_s10  ;;  %v289_v2 = vcombine.high %v319_v0, %v319_v0  ;;  %v1381_v3 = vld [vmem:[%s1364_s25 + $0x4] sm:$0xff]  ;;  %v290_v5 = vcombine.high %v286_v1, %v286_v1  ;;  %v324_v6 = vcombine.low %v286_v1, %v286_v1  ;;  %s1176_s27 = smov 25   ;;  %s1177_s7 = smov 20   ;;  %v312_v7 = vld [vmem:[%s1372_s8] sm:$0xf]  ;;  %v1183_v23 = vmov 0  }
  0x5a   : > { %v472_v4 = vcombine.high %v1381_v3, %v1381_v3  ;;  %428 = vst [vmem:[#allocation2 + $0x40] sm:$0xf] %v1381_v3  ;;  %v323_v8 = vcombine.low %v319_v0, %v319_v0  ;;  %v1015_v9 = vld [vmem:[%s1372_s8] ss:$0 sps:$4 sm:$0xff]   ;;  %v424_v11 = vld [vmem:[%s1364_s25 + $0xc] sm:$0xf]  ;;  %v437_v20 = vcombine.low %v1381_v3, %v1381_v3  ;;  %679 = vmatprep.mubr.f32.mxu0 %v1182_v22 }
  0x5b   : > { %v381_v10 = vld [vmem:[%s1372_s8] sm:$0xf]  ;;  %430 = vst [vmem:[#allocation2 + $0x50] sm:$0xf] %v424_v11  ;;  %v1017_v14 = vld [vmem:[%s1364_s25 + $0xc] ss:$0 sps:$4 sm:$0xff]   ;;  %750 = vmatprep.mubr.f32.mxu1 %v1182_v22  ;;  %1010 = vset.pattern.permute.xlu0 %v1183_v23 }
  0x5c   : > { %429 = vst [vmem:[#allocation2 + $0x48] sm:$0xf] %v472_v4  ;;  %v431_v12 = vld [vmem:[%s1372_s8] sm:$0xf]  ;;  %s1178_s26 = smov 108   ;;  %s1179_s5 = smov 103  }
  0x5d   : > { %331 = vrot.lane.b32.xlu1 %v286_v1, %s1174_s11  ;;  %293 = vrot.lane.b32.xlu0 %v289_v2, %s1175_s10  ;;  %v1016_v13 = vld [vmem:[%s1372_s8] ss:$0 sps:$4 sm:$0xff]   ;;  %432 = vst [vmem:[#allocation2 + $0x58] sm:$0xf] %v431_v12  ;;  %v469_v17 = vld [vmem:[%s1364_s25 + $0xc] sm:$0xf] }
  0x5e   : > { %v455_v15 = vld [vmem:[%s1372_s8] sm:$0xff]  ;;  %v1022_v19 = vld [vmem:[%s1364_s25 + $0xc] ss:$0 sps:$4 sm:$0xff]   ;;  %s1180_s24 = smov 83   ;;  %s1181_s6 = smov 63   ;;  %vm344_vm0 = vcmask 367620  }
  0x5f   : > { %v457_v16 = vcombine.low %v455_v15, %v455_v15  ;;  %v491_v18 = vcombine.high %v455_v15, %v455_v15  ;;  %v538_v21 = vld [vmem:[%s1364_s25 + $0xc] sm:$0xf]  ;;  %v592_v24 = vld [vmem:[%s1490_s3] sm:$0xff]  ;;  %vm299_vm1 = vcmask 531456   ;;  %vm310_vm2 = vcmask 527360   ;;  %s902_s13 = sshll.u32 %s1360_s12, 5 }
  0x60   : > { %vm333_vm3 = vcmask 367616   ;;  %vm368_vm4 = vcmask 203776   ;;  %vm379_vm5 = vcmask 199680   ;;  %vm413_vm6 = vcmask 162820   ;;  %s916_s21 = sshll.u32 %s1162_s18, 9  ;;  %s279_s8 = scalar_lea.vmem [#allocation8], %s902_s13 }
  0x61   : > { %297 = vrot.lane.b32.xlu1 %v290_v5, %s1175_s10  ;;  %329 = vrot.lane.b32.xlu0 %v324_v6, %s1174_s11  ;;  %vm402_vm7 = vcmask 162816   ;;  %vm317_vm8 = vcmask 1043976   ;;  %vm352_vm9 = vcmask 1047916   ;;  %vm386_vm10 = vcmask 1043656   ;;  %s762_s18 = scalar_lea.sflag [#allocation5], %s1360_s12  ;;  %p1504_p5 = scmp.ne.s32.totalorder %s1496_s28, 0 }
  0x62   : > { %vm421_vm11 = vcmask 1047716   ;;  %vm453_vm12 = vcmask 883716   ;;  %vm445_vm13 = vcmask 883712   ;;  %vm465_vm14 = vcmask 1048420  }
  0x63   : > { %vm487_vm15 = vcmask 838656  }
  0x65   : > { %364 = vrot.lane.b32.xlu1 %v286_v1, %s1176_s27  ;;  %362 = vrot.lane.b32.xlu0 %v289_v2, %s1176_s27 }
  0x69   : > { %396 = vrot.lane.b32.xlu1 %v319_v0, %s1177_s7  ;;  %366 = vrot.lane.b32.xlu0 %v290_v5, %s1176_s27 }
  0x6d   : > { %400 = vrot.lane.b32.xlu1 %v286_v1, %s1177_s7  ;;  %398 = vrot.lane.b32.xlu0 %v324_v6, %s1177_s7 }
  0x71   : > { %314 = vrot.lane.b32.xlu1 %v312_v7, %s1175_s10  ;;  %291 = vrot.lane.b32.xlu0 %v319_v0, %s1175_s10 }
  0x75   : > { %349 = vrot.lane.b32.xlu1 %v1015_v9, %s1174_s11  ;;  %325 = vrot.lane.b32.xlu0 %v323_v8, %s1174_s11  ;;  %s778_s11 = sshll.u32 %s279_s8, 4  ;;  %s1440_s11 = int_to_ptr.vmem [resolvable:$true] %s778_s11 }
  0x79   : > { %383 = vrot.lane.b32.xlu1 %v381_v10, %s1176_s27  ;;  %360 = vrot.lane.b32.xlu0 %v319_v0, %s1176_s27 }
  0x7d   : > { %418 = vrot.lane.b32.xlu1 %v1016_v13, %s1177_s7  ;;  %394 = vrot.lane.b32.xlu0 %v323_v8, %s1177_s7  ;;  %s1438_s7 = scalar_lea.hbm %s1491_s4, %s916_s21 }
  0x81   : > { %443 = vrot.lane.b32.xlu1 %v1017_v14, %s1178_s26  ;;  %441 = vrot.lane.b32.xlu0 %v1381_v3, %s1178_s26 }
  0x85   : > { %460 = vrot.lane.b32.xlu1 %v455_v15, %s1178_s26  ;;  %458 = vrot.lane.b32.xlu0 %v457_v16, %s1178_s26 }
  0x89   : > { %477 = vrot.lane.b32.xlu1 %v469_v17, %s1179_s5  ;;  %475 = vrot.lane.b32.xlu0 %v472_v4, %s1179_s5 }
  0x8d   : > { %494 = vrot.lane.b32.xlu1 %v491_v18, %s1179_s5  ;;  %492 = vrot.lane.b32.xlu0 %v455_v15, %s1179_s5 }
  0x91   : > { %512 = vrot.lane.b32.xlu1 %v1022_v19, %s1180_s24  ;;  %510 = vrot.lane.b32.xlu0 %v1381_v3, %s1180_s24 }
  0x95   : > { %529 = vrot.lane.b32.xlu1 %v455_v15, %s1180_s24  ;;  %527 = vrot.lane.b32.xlu0 %v457_v16, %s1180_s24 }
  0x99   : > { %473 = vrot.lane.b32.xlu1 %v1381_v3, %s1179_s5  ;;  %439 = vrot.lane.b32.xlu0 %v437_v20, %s1178_s26  ;;  %s1084_s26 = scalar_lea.vmem %s1440_s11, 512  ;;  %s1184_s5 = smov [#allocation8]  }
  0x9a   : > { %p1085_p0 = scmp.ne.s32.totalorder %s1440_s11, %s1084_s26 }
  0x9c   : > { %p1086_p7 = pnand %p1085_p0, %p1504_p5 }
  0x9d   : > { %544 = vrot.lane.b32.xlu1 %v472_v4, %s1181_s6  ;;  %508 = vrot.lane.b32.xlu0 %v437_v20, %s1180_s24  ;;  %s1088_s24 = sshll.u32 %s1184_s5, 4  ;;  %s1089_s24 = int_to_ptr.vmem [resolvable:$false] %s1088_s24 }
  0x9e   : > { %p1087_p4 = pneg %p1086_p7  ;;  %p1091_p10 = scmp.lt.s32.totalorder %s1440_s11, %s1089_s24 }
  0xa1   : > { %561 = vrot.lane.b32.xlu1 %v455_v15, %s1181_s6  ;;  %546 = vrot.lane.b32.xlu0 %v538_v21, %s1181_s6 }
  0xa5   : > { %542 = vrot.lane.b32.xlu1 %v1381_v3, %s1181_s6  ;;  %563 = vrot.lane.b32.xlu0 %v491_v18, %s1181_s6  ;;  %s1090_s6 = scalar_lea.vmem %s1089_s24, 1024 }
  0xa6   : > { %p1092_p12 = scmp.lt.s32.totalorder %s1090_s6, %s1084_s26 }
  0xa8   : > { %p1093_p1 = por %p1092_p12, %p1091_p10 }
  0xa9   : > { %595 = vperm.xlu0 %1010, %v592_v24  }
  0xaa   : > { %p1094_p2 = pnand %p1093_p1, %p1087_p4 }
  0xcb   : > { %v328_v25 = vpop.permute.xlu1 %327  ;;  %v296_v26 = vpop.permute.xlu0 %295 }
  0xcf   : > { %v332_v27 = vpop.permute.xlu1 %331  ;;  %v294_v28 = vpop.permute.xlu0 %293 }
  0xd0   : > { %345 = vst.msk [vmem:[#allocation2 + $0x18] sm:$0xf0] %vm344_vm0, %v332_v27  ;;  %v301_v29 = vsel %vm299_vm1, %v294_v28, %v296_v26  ;;  %vm479_vm0 = vcmask 842752  }
  0xd1   : > { %308 = vst [vmem:[#allocation2 + $0x8] sm:$0xf] %v301_v29 }
  0xd3   : > { %v298_v30 = vpop.permute.xlu1 %297  ;;  %v330_v31 = vpop.permute.xlu0 %329 }
  0xd4   : > { %v302_v32 = vsel %vm299_vm1, %v296_v26, %v298_v30  ;;  %311 = vst.msk [vmem:[#allocation2 + $0x18] sm:$0xf] %vm310_vm2, %v298_v30  ;;  %v335_v33 = vsel %vm333_vm3, %v328_v25, %v330_v31  ;;  %v336_v34 = vsel %vm333_vm3, %v330_v31, %v332_v27  ;;  %vm522_vm2 = vcmask 678916  }
  0xd5   : > { %309 = vst [vmem:[#allocation2 + $0x10] sm:$0xf] %v302_v32  ;;  %342 = vst [vmem:[#allocation2 + $0x8] sm:$0xf0] %v335_v33 }
  0xd6   : > { %343 = vst [vmem:[#allocation2 + $0x10] sm:$0xf0] %v336_v34 }
  0xd7   : > { %v365_v35 = vpop.permute.xlu1 %364  ;;  %v363_v36 = vpop.permute.xlu0 %362 }
  0xd8   : > { %v370_v37 = vsel %vm368_vm4, %v363_v36, %v365_v35 }
  0xd9   : > { %377 = vst [vmem:[#allocation2 + $0x28] sm:$0xf] %v370_v37 }
  0xdb   : > { %v397_v38 = vpop.permute.xlu1 %396  ;;  %v367_v39 = vpop.permute.xlu0 %366 }
  0xdc   : > { %v371_v40 = vsel %vm368_vm4, %v365_v35, %v367_v39  ;;  %380 = vst.msk [vmem:[#allocation2 + $0x38] sm:$0xf] %vm379_vm5, %v367_v39  ;;  %v573_v51 = vld [vmem:[#allocation2 + $0x8] sm:$0xff]  ;;  %vm548_vm5 = vcmask 515072  }
  0xdd   : > { %378 = vst [vmem:[#allocation2 + $0x30] sm:$0xf] %v371_v40  ;;  %v574_v8 = vld [vmem:[#allocation2 + $0x10] sm:$0xff] }
  0xdf   : > { %v401_v41 = vpop.permute.xlu1 %400  ;;  %v399_v42 = vpop.permute.xlu0 %398 }
  0xe0   : > { %414 = vst.msk [vmem:[#allocation2 + $0x38] sm:$0xf0] %vm413_vm6, %v401_v41  ;;  %v404_v43 = vsel %vm402_vm7, %v397_v38, %v399_v42  ;;  %v405_v44 = vsel %vm402_vm7, %v399_v42, %v401_v41  ;;  %vm556_vm6 = vcmask 510976  }
  0xe1   : > { %411 = vst [vmem:[#allocation2 + $0x28] sm:$0xf0] %v404_v43  ;;  %412 = vst [vmem:[#allocation2 + $0x30] sm:$0xf0] %v405_v44 }
  0xe3   : > { %v315_v45 = vpop.permute.xlu1 %314  ;;  %v292_v46 = vpop.permute.xlu0 %291 }
  0xe4   : > { %318 = vst.msk [vmem:[#allocation2 + $0x18] sm:$0xf] %vm317_vm8, %v315_v45  ;;  %v300_v47 = vsel %vm299_vm1, %v292_v46, %v294_v28  ;;  %vm499_vm1 = vcmask 1044280   ;;  %vm602_vm8 = vcmask 1043456  }
  0xe5   : > { %307 = vst [vmem:[#allocation2] sm:$0xf] %v300_v47 }
  0xe7   : > { %v350_v48 = vpop.permute.xlu1 %349  ;;  %v326_v49 = vpop.permute.xlu0 %325 }
  0xe8   : > { %353 = vst.msk [vmem:[#allocation2 + $0x18] sm:$0xf0] %vm352_vm9, %v350_v48  ;;  %v334_v50 = vsel %vm333_vm3, %v326_v49, %v328_v25  ;;  %v577_v52 = vld [vmem:[#allocation2 + $0x28] sm:$0xff]  ;;  %v578_v63 = vld [vmem:[#allocation2 + $0x30] sm:$0xff]  ;;  %vm514_vm3 = vcmask 678912   ;;  %vm598_vm9 = vcmask 293888  }
  0xe9   : > { %341 = vst [vmem:[#allocation2] sm:$0xf0] %v334_v50  ;;  %v917_v53 = vpack.c.bf16 %v577_v52, %v573_v51  ;;  %v927_v10 = vpack.c.bf16 %v578_v63, %v574_v8  ;;  %v571_v50 = vld [vmem:[%s1489_s2] sm:$0xff] }
  0xeb   : > { %v384_v54 = vpop.permute.xlu1 %383  ;;  %918 = vmatprep.subr.bf16.mxu0 %v917_v53  ;;  %v361_v55 = vpop.permute.xlu0 %360 }
  0xec   : > { %387 = vst.msk [vmem:[#allocation2 + $0x38] sm:$0xf] %vm386_vm10, %v384_v54  ;;  %v369_v56 = vsel %vm368_vm4, %v361_v55, %v363_v36  ;;  %vm534_vm4 = vcmask 1048220  }
  0xed   : > { %376 = vst [vmem:[#allocation2 + $0x20] sm:$0xf] %v369_v56 }
  0xef   : > { %v419_v57 = vpop.permute.xlu1 %418  ;;  %v395_v58 = vpop.permute.xlu0 %394  ;;  %v575_v2 = vld [vmem:[#allocation2 + $0x18] sm:$0xff] }
  0xf0   : > { %422 = vst.msk [vmem:[#allocation2 + $0x38] sm:$0xf0] %vm421_vm11, %v419_v57  ;;  %v403_v59 = vsel %vm402_vm7, %v395_v58, %v397_v38  ;;  %v572_v6 = vld [vmem:[#allocation2] sm:$0xff]  ;;  %vm568_vm7 = vcmask 1043960  }
  0xf1   : > { %410 = vst [vmem:[#allocation2 + $0x20] sm:$0xf0] %v403_v59 }
  0xf3   : > { %v444_v60 = vpop.permute.xlu1 %443  ;;  %v442_v61 = vpop.permute.xlu0 %441 }
  0xf4   : > { %454 = vst.msk [vmem:[#allocation2 + $0x50] sm:$0xf0] %vm453_vm12, %v444_v60  ;;  %v447_v62 = vsel %vm445_vm13, %v442_v61, %v444_v60 }
  0xf5   : > { %452 = vst [vmem:[#allocation2 + $0x48] sm:$0xf0] %v447_v62 }
  0xf7   : > { %v461_v0 = vpop.permute.xlu1 %460  ;;  %v459_v1 = vpop.permute.xlu0 %458  ;;  %v579_v3 = vld [vmem:[#allocation2 + $0x38] sm:$0xff] }
  0xf8   : > { %v462_v4 = vsel %vm445_vm13, %v459_v1, %v461_v0  ;;  %466 = vst.msk [vmem:[#allocation2 + $0x50] sm:$0xf0] %vm465_vm14, %v459_v1  ;;  %v925_v5 = vpack.c.bf16 %v579_v3, %v575_v2  ;;  %v576_v7 = vld [vmem:[#allocation2 + $0x20] sm:$0xff] }
  0xf9   : > { %467 = vst [vmem:[#allocation2 + $0x58] sm:$0xf0] %v462_v4  ;;  %v919_v9 = vpack.c.bf16 %v576_v7, %v572_v6 }
  0xfa   : > { %926 = vmatprep.subr.bf16.mxu1 %v925_v5 }
  0xfb   : > { %v478_v11 = vpop.permute.xlu1 %477  ;;  %920 = vmatpush1.bf16.msra.mxu0 %v919_v9  ;;  %928 = vmatpush1.bf16.msra.mxu1 %v927_v10  ;;  %v476_v12 = vpop.permute.xlu0 %475 }
  0xfc   : > { %488 = vst.msk [vmem:[#allocation2 + $0x70] sm:$0xf] %vm487_vm15, %v478_v11  ;;  %v481_v13 = vsel %vm479_vm0, %v476_v12, %v478_v11  ;;  %v581_v27 = vld [vmem:[#allocation2 + $0x48] sm:$0xff] }
  0xfd   : > { %486 = vst [vmem:[#allocation2 + $0x68] sm:$0xf] %v481_v13 }
  0xff   : > { %v495_v14 = vpop.permute.xlu1 %494  ;;  %v493_v15 = vpop.permute.xlu0 %492  ;;  %v582_v37 = vld [vmem:[#allocation2 + $0x50] sm:$0xff] }
 0x100   : > { %v496_v16 = vsel %vm479_vm0, %v493_v15, %v495_v14  ;;  %500 = vst.msk [vmem:[#allocation2 + $0x70] sm:$0xf] %vm499_vm1, %v493_v15  ;;  %v583_v34 = vld [vmem:[#allocation2 + $0x58] sm:$0xff] }
 0x101   : > { %501 = vst [vmem:[#allocation2 + $0x78] sm:$0xf] %v496_v16 }
 0x103   : > { %v513_v17 = vpop.permute.xlu1 %512  ;;  %v511_v18 = vpop.permute.xlu0 %510 }
 0x104   : > { %523 = vst.msk [vmem:[#allocation2 + $0x70] sm:$0xf0] %vm522_vm2, %v513_v17  ;;  %v516_v19 = vsel %vm514_vm3, %v511_v18, %v513_v17 }
 0x105   : > { %521 = vst [vmem:[#allocation2 + $0x68] sm:$0xf0] %v516_v19 }
 0x107   : > { %v530_v20 = vpop.permute.xlu1 %529  ;;  %v528_v21 = vpop.permute.xlu0 %527 }
 0x108   : > { %v531_v22 = vsel %vm514_vm3, %v528_v21, %v530_v20  ;;  %535 = vst.msk [vmem:[#allocation2 + $0x70] sm:$0xf0] %vm534_vm4, %v528_v21 }
 0x109   : > { %536 = vst [vmem:[#allocation2 + $0x78] sm:$0xf0] %v531_v22 }
 0x10b   : > { %v474_v23 = vpop.permute.xlu1 %473  ;;  %v440_v24 = vpop.permute.xlu0 %439 }
 0x10c   : > { %v480_v25 = vsel %vm479_vm0, %v474_v23, %v476_v12  ;;  %v446_v26 = vsel %vm445_vm13, %v440_v24, %v442_v61  ;;  %v585_v28 = vld [vmem:[#allocation2 + $0x68] sm:$0xff] }
 0x10d   : > { %485 = vst [vmem:[#allocation2 + $0x60] sm:$0xf] %v480_v25  ;;  %451 = vst [vmem:[#allocation2 + $0x40] sm:$0xf0] %v446_v26  ;;  %v921_v29 = vpack.c.bf16 %v585_v28, %v581_v27 }
 0x10f   : > { %v545_v30 = vpop.permute.xlu1 %544  ;;  %922 = vmatprep.subr.bf16.mxu0 %v921_v29  ;;  %v509_v31 = vpop.permute.xlu0 %508  ;;  %v586_v32 = vld [vmem:[#allocation2 + $0x70] sm:$0xff] }
 0x110   : > { %v515_v33 = vsel %vm514_vm3, %v509_v31, %v511_v18  ;;  %v587_v35 = vld [vmem:[#allocation2 + $0x78] sm:$0xff]  ;;  %v931_v38 = vpack.c.bf16 %v586_v32, %v582_v37 }
 0x111   : > { %520 = vst [vmem:[#allocation2 + $0x60] sm:$0xf0] %v515_v33  ;;  %v929_v36 = vpack.c.bf16 %v587_v35, %v583_v34 }
 0x113   : > { %v562_v39 = vpop.permute.xlu1 %561  ;;  %930 = vmatprep.subr.bf16.mxu1 %v929_v36  ;;  %v547_v40 = vpop.permute.xlu0 %546 }
 0x114   : > { %v550_v41 = vsel %vm548_vm5, %v545_v30, %v547_v40  ;;  %557 = vst.msk [vmem:[#allocation2 + $0x90] sm:$0xf] %vm556_vm6, %v547_v40  ;;  %932 = vmatpush1.bf16.msra.mxu1 %v931_v38  ;;  %v580_v46 = vld [vmem:[#allocation2 + $0x40] sm:$0xff] }
 0x115   : > { %555 = vst [vmem:[#allocation2 + $0x88] sm:$0xf] %v550_v41  ;;  %569 = vst.msk [vmem:[#allocation2 + $0x90] sm:$0xf] %vm568_vm7, %v562_v39 }
 0x117   : > { %v543_v42 = vpop.permute.xlu1 %542  ;;  %v564_v43 = vpop.permute.xlu0 %563 }
 0x118   : > { %v549_v44 = vsel %vm548_vm5, %v543_v42, %v545_v30  ;;  %v565_v45 = vsel %vm548_vm5, %v562_v39, %v564_v43  ;;  %v584_v47 = vld [vmem:[#allocation2 + $0x60] sm:$0xff] }
 0x119   : > { %554 = vst [vmem:[#allocation2 + $0x80] sm:$0xf] %v549_v44  ;;  %570 = vst [vmem:[#allocation2 + $0x98] sm:$0xf] %v565_v45  ;;  %v923_v48 = vpack.c.bf16 %v584_v47, %v580_v46 }
 0x11b   : > { %924 = vmatpush1.bf16.msra.mxu0 %v923_v48 }
 0x11c   : > { %v589_v49 = vld [vmem:[#allocation2 + $0x88] sm:$0xf]  ;;  %v590_v53 = vld [vmem:[#allocation2 + $0x90] sm:$0xf] }
 0x11d   : > { %903 = vmatprep.subr.msk.mxu0 %vm602_vm8, %v589_v49 }
 0x120   : > { %v588_v51 = vld [vmem:[#allocation2 + $0x80] sm:$0xf]  ;;  %v591_v52 = vld [vmem:[#allocation2 + $0x98] sm:$0xf] }
 0x121   : > { %904 = vmatpush1.msk.msra.mxu0 %vm602_vm8, %v588_v51  ;;  %906 = vmatprep.subr.msk.mxu1 %vm602_vm8, %v591_v52 }
 0x122   : > { %905 = vmatmul.mubr.msk.f32.vlgmr.msra.gmra.mrb[0].mxu0 %vm598_vm9, %v571_v50  ;;  %907 = vmatpush1.msk.msra.mxu1 %vm602_vm8, %v590_v53 }
 0x123   : > { %908 = vmatmul.mubr.msk.f32.vlgmr.msra.gmra.mrb[0].mxu1 %vm598_vm9, %v571_v50 }
 0x128   : > { %v596_v54 = vpop.permute.xlu0 %595 }
 0x1f5   : > { %v681_v55 = vpop.f32.mrb[0].mxu0 }
 0x1f6   : > { %v683_v56 = vpop.f32.mrb[1].mxu0  ;;  %v752_v57 = vpop.f32.mrb[0].mxu1  ;;  %v682_v58 = vadd.f32 %v681_v55, %v596_v54 }
 0x1f7   : > { %v684_v59 = vadd.f32 %v683_v56, %v596_v54  ;;  %v753_v60 = vadd.f32 %v752_v57, %v596_v54  ;;  %v754_v61 = vpop.f32.mrb[1].mxu1 }
 0x1f8   : > { %757 = vst [vmem:[%s279_s8] sm:$0xff] %v682_v58  ;;  %v755_v62 = vadd.f32 %v754_v61, %v596_v54 }
 0x1f9   : > { %758 = vst [vmem:[%s279_s8 + $0x8] sm:$0xff] %v684_v59  ;;  %759 = vst [vmem:[%s279_s8 + $0x10] sm:$0xff] %v753_v60 }
 0x1fa   : > { %760 = vst [vmem:[%s279_s8 + $0x18] sm:$0xff] %v755_v62 }
 0x1fb   : > { %1097 = shalt.err (!%p1094_p2)
}
 0x1fc   : > { %s1098_s12 = scalar_lea.hbm %s1438_s7, 512  ;;  %s1102_s22 = scalar_lea.hbm %s1491_s4, 1024 }
 0x1fd   : > { %p1099_p9 = scmp.ne.s32.totalorder %s1438_s7, %s1098_s12  ;;  %p1103_p6 = scmp.lt.u32.totalorder %s1438_s7, %s1491_s4 }
 0x1fe   : > { %p1104_p13 = scmp.lt.u32.totalorder %s1102_s22, %s1098_s12  ;;  %p1106_p0 = scmp.lt.u32.totalorder %s1098_s12, %s1438_s7 }
 0x1ff   : > { %p1100_p11 = pnand %p1099_p9, %p1504_p5 }
 0x200   : > { %p1105_p8 = por %p1104_p13, %p1103_p6 }
 0x201   : > { %p1101_p3 = pneg %p1100_p11 }
 0x202   : > { %p1107_p7 = por %p1106_p0, %p1105_p8 }
 0x204   : > { %p1108_p4 = pnand %p1107_p7, %p1101_p3 }
 0x206   : > { %1111 = shalt.err (!%p1108_p4)
}
 0x207   : > { %937 = dma.vmem_to_hbm [thread:$0]  (%p1504_p5), %s1440_s11, 512, %s1438_s7, %s762_s18  }
 0x208 PF: > { %s790_s21 = sand.u32 1, %s1150_s15   ;;  %p1505_p10 = scmp.ne.s32.totalorder %s1497_s30, 0 }
 0x209   : > { %p1506_p12 = scmp.ge.s32.totalorder %s1170_s20, 2  ;;  %s791_s8 = scalar_lea.sflag [#allocation5], %s790_s21 }
 0x20b   : > { %p947_p1 = pnand %p1506_p12, %p1505_p10 }
 0x20d   : > { %1145 = dma.done.wait (!%p947_p1), %s791_s8, 512  }
 0x20e   : > { %1147 = vsyncadd (!%p947_p1), %s791_s8, 4294966784  ;;  %s23_s20 = sadd.s32 1, %s1170_s20   ;;  %s1507_s15 = smov %s1154_s16 }
 0x20f   : > { %p20_p2 = scmp.ge.s32.totalorder %s23_s20, 4   ;;  %s1508_s16 = smov %s1158_s17 }
 0x210   : > { %s1509_s17 = smov %s1266_s29  ;;  %s1510_s18 = smov %s1166_s19 }
 0x211   : > { %s1511_s19 = smov %s1513_s23  ;;  %22 = sbr.rel (!%p20_p2) target bundleno = 8 (0x8), region = 94 }
 0x218   :  { %796 = vsyncpa [#allocation4], 1 }
 0x219   :  { %798 = vsyncpa [#allocation4 + $0x1], 1 }
 0x21a   :  { %799 = vsyncpa [#allocation7], 1 }
 0x21b   :  { %801 = vsyncpa [#allocation7 + $0x1], 1 }
 0x21c   :  { %802 = vsyncpa [#allocation5], 1 }
 0x21d   :  { %804 = vsyncpa [#allocation5 + $0x1], 1 }

</bundles_post_ra>
